<compile_context>
chip_gen: v6e
topology: v6e:2x2x1
jax: 0.10.0
libtpu: 0.0.40
codegen_flags: <defaults>
</compile_context>

<pallas_src>
import functools
import math

import jax
import jax.numpy as jnp
from jax.experimental import pallas as pl
from jax.experimental.pallas import tpu as pltpu


# ---------------------------------------------------------------------------
# Kernels
# ---------------------------------------------------------------------------
def _graph_block_kernel(adj_ref, h_ref, w_ref, b_ref, out_ref, acc_ref):
    """One DenseGraphConv block, accumulated over the k (adj-column) axis:

        acc[row tile] = sum_k adj[row tile, k tile] @ h[k tile]
        out[row tile] = acc @ W + b          (last k step only)
    """
    k = pl.program_id(1)

    @pl.when(k == 0)
    def _():
        acc_ref[...] = jnp.zeros_like(acc_ref)

    acc_ref[...] += jnp.dot(adj_ref[...], h_ref[...].astype(jnp.bfloat16),
                            preferred_element_type=jnp.float32)

    @pl.when(k == pl.num_programs(1) - 1)
    def _():
        out_ref[...] = jnp.dot(acc_ref[...].astype(jnp.bfloat16), w_ref[...],
                               preferred_element_type=jnp.float32) + b_ref[...]


def _graph_block_fused_kernel(apply_log_softmax, nclass,
                              adj_ref, h_ref, w_ref, b_ref,
                              res_ref, lin_w_ref, lin_b_ref,
                              out_ref, acc_ref):
    """Last DenseGraphConv block of a layer fused with the per-row epilogue:

        acc = sum_k adj[row tile, k tile] @ h[k tile]
        h   = acc @ W + b
        h   = relu(h + residual)
        y   = h @ lin_W + lin_b              (fc1 or fc2)
        y   = log_softmax(y)                 (final layer only; padded class
                                              columns masked out)
    """
    k = pl.program_id(1)

    @pl.when(k == 0)
    def _():
        acc_ref[...] = jnp.zeros_like(acc_ref)

    acc_ref[...] += jnp.dot(adj_ref[...], h_ref[...].astype(jnp.bfloat16),
                            preferred_element_type=jnp.float32)

    @pl.when(k == pl.num_programs(1) - 1)
    def _():
        h = jnp.dot(acc_ref[...].astype(jnp.bfloat16), w_ref[...],
                    preferred_element_type=jnp.float32) + b_ref[...]
        h = jnp.maximum(h + res_ref[...], 0.0)          # relu(gc(x, adj) + x)
        y = jnp.dot(h.astype(jnp.bfloat16), lin_w_ref[...],
                    preferred_element_type=jnp.float32) + lin_b_ref[...]
        if apply_log_softmax:
            col = jax.lax.broadcasted_iota(jnp.int32, y.shape, 1)
            y = jnp.where(col < nclass, y, jnp.float32(-1e30))
            m = jnp.max(y, axis=1, keepdims=True)
            z = y - m
            lse = jnp.log(jnp.sum(jnp.exp(z), axis=1, keepdims=True))
            y = z - lse
        out_ref[...] = y


# ---------------------------------------------------------------------------
# pallas_call wrappers
# ---------------------------------------------------------------------------
def _compiler_params():
    # 48 MiB leaves headroom on v7x (64 MiB physical VMEM per TC) while being
    # well above anything these tiles actually need.
    return pltpu.CompilerParams(
        dimension_semantics=("parallel", "arbitrary"),
        vmem_limit_bytes=48 << 20)


def _graph_block_call(adj_b, h, w_b, b, *, fp, tm, tk):
    n = adj_b.shape[0]
    grid = (n // tm, n // tk)
    cost = pl.CostEstimate(
        flops=2 * n * n * fp + 2 * n * fp * fp,
        transcendentals=0,
        bytes_accessed=(n * n * 2 + (n // tm) * n * fp * 4
                        + n * fp * 4 + fp * fp * 2 + fp * 4))
    return pl.pallas_call(
        _graph_block_kernel,
        out_shape=jax.ShapeDtypeStruct((n, fp), jnp.float32),
        grid_spec=pltpu.PrefetchScalarGridSpec(
            num_scalar_prefetch=0,
            grid=grid,
            in_specs=[
                pl.BlockSpec((tm, tk), lambda i, k: (i, k)),   # adj tile (bf16)
                pl.BlockSpec((tk, fp), lambda i, k: (k, 0)),   # h rows for k tile
                pl.BlockSpec((fp, fp), lambda i, k: (0, 0)),   # block weight (bf16)
                pl.BlockSpec((1, fp), lambda i, k: (0, 0)),    # block bias (f32)
            ],
            out_specs=pl.BlockSpec((tm, fp), lambda i, k: (i, 0)),
            scratch_shapes=[pltpu.VMEM((tm, fp), jnp.float32)]),
        compiler_params=_compiler_params(),
        cost_estimate=cost,
    )(adj_b, h, w_b, b)


def _graph_block_fused_call(adj_b, h, w_b, b, res, lin_w, lin_b, *,
                            apply_log_softmax, nclass, fp, tm, tk):
    n = adj_b.shape[0]
    grid = (n // tm, n // tk)
    kernel = functools.partial(_graph_block_fused_kernel,
                               apply_log_softmax, nclass)
    cost = pl.CostEstimate(
        flops=2 * n * n * fp + 4 * n * fp * fp,
        transcendentals=n * fp if apply_log_softmax else 0,
        bytes_accessed=(n * n * 2 + (n // tm) * n * fp * 4
                        + 2 * n * fp * 4 + 2 * fp * fp * 2 + 2 * fp * 4))
    return pl.pallas_call(
        kernel,
        out_shape=jax.ShapeDtypeStruct((n, fp), jnp.float32),
        grid_spec=pltpu.PrefetchScalarGridSpec(
            num_scalar_prefetch=0,
            grid=grid,
            in_specs=[
                pl.BlockSpec((tm, tk), lambda i, k: (i, k)),   # adj tile (bf16)
                pl.BlockSpec((tk, fp), lambda i, k: (k, 0)),   # h rows for k tile
                pl.BlockSpec((fp, fp), lambda i, k: (0, 0)),   # block weight (bf16)
                pl.BlockSpec((1, fp), lambda i, k: (0, 0)),    # block bias (f32)
                pl.BlockSpec((tm, fp), lambda i, k: (i, 0)),   # residual rows (f32)
                pl.BlockSpec((fp, fp), lambda i, k: (0, 0)),   # fc weight (bf16)
                pl.BlockSpec((1, fp), lambda i, k: (0, 0)),    # fc bias (f32)
            ],
            out_specs=pl.BlockSpec((tm, fp), lambda i, k: (i, 0)),
            scratch_shapes=[pltpu.VMEM((tm, fp), jnp.float32)]),
        compiler_params=_compiler_params(),
        cost_estimate=cost,
    )(adj_b, h, w_b, b, res, lin_w, lin_b)


# ---------------------------------------------------------------------------
# Forward pass
# ---------------------------------------------------------------------------
def _pad_to(a, shape, dtype):
    pads = [(0, s - d) for d, s in zip(a.shape, shape)]
    return jnp.pad(a, pads).astype(dtype)


def dense_gcn_forward(x, adj, params, *, nblocks, tm=256, tk=512):
    """x: (N, nfeat) f32, adj: (N, N) f32 (normalized, dense). Returns (N, nclass)."""
    n, nfeat = x.shape
    nhid = params["fc1_w"].shape[1]
    nclass = params["fc2_w"].shape[1]

    # Lane-dense padded feature width shared by every activation/weight.
    fp = 128 * pl.cdiv(max(nfeat, nhid, nclass), 128)

    # Clamp tiles to the (128-padded) node count, then pad N to a multiple of
    # lcm(tm, tk) so both grid axes divide evenly.
    cap = 128 * pl.cdiv(n, 128)
    tm = min(tm, cap)
    tk = min(tk, cap)
    step = math.lcm(tm, tk)
    n_p = pl.cdiv(n, step) * step

    x_p = _pad_to(x, (n_p, fp), jnp.float32)
    adj_b = _pad_to(adj, (n_p, n_p), jnp.bfloat16)

    gc1_w = _pad_to(params["gc1_w"], (nblocks, fp, fp), jnp.bfloat16)
    gc1_b = _pad_to(params["gc1_b"], (nblocks, 1, fp), jnp.float32)
    fc1_w = _pad_to(params["fc1_w"], (fp, fp), jnp.bfloat16)
    fc1_b = _pad_to(params["fc1_b"], (1, fp), jnp.float32)
    gc2_w = _pad_to(params["gc2_w"], (nblocks, fp, fp), jnp.bfloat16)
    gc2_b = _pad_to(params["gc2_b"], (nblocks, 1, fp), jnp.float32)
    fc2_w = _pad_to(params["fc2_w"], (fp, fp), jnp.bfloat16)
    fc2_b = _pad_to(params["fc2_b"], (1, fp), jnp.float32)

    # ---- layer 1: gc1 blocks, then fused (last block + relu residual + fc1) ----
    h = x_p
    for blk in range(nblocks - 1):
        h = _graph_block_call(adj_b, h, gc1_w[blk], gc1_b[blk],
                              fp=fp, tm=tm, tk=tk)
    h = _graph_block_fused_call(adj_b, h, gc1_w[nblocks - 1], gc1_b[nblocks - 1],
                                x_p, fc1_w, fc1_b,
                                apply_log_softmax=False, nclass=nclass,
                                fp=fp, tm=tm, tk=tk)
    # dropout(training=False) -> identity
    x1 = h

    # ---- layer 2: gc2 blocks, then fused (last block + relu + fc2 + log_softmax) ----
    for blk in range(nblocks - 1):
        h = _graph_block_call(adj_b, h, gc2_w[blk], gc2_b[blk],
                              fp=fp, tm=tm, tk=tk)
    out_p = _graph_block_fused_call(adj_b, h, gc2_w[nblocks - 1], gc2_b[nblocks - 1],
                                    x1, fc2_w, fc2_b,
                                    apply_log_softmax=True, nclass=nclass,
                                    fp=fp, tm=tm, tk=tk)
    return out_p[:n, :nclass]


# ---------------------------------------------------------------------------
# Parameters & reference
# ---------------------------------------------------------------------------
def init_params(key, *, nblocks, nfeat, nhid, nclass):
    """Deterministic synthetic parameters matching the module's shapes.

    Linear weights are stored pre-transposed to (in, out); biases kept 2-D
    (1, out) / (nblocks, 1, out) so they broadcast cleanly on TPU.
    """
    ks = jax.random.split(key, 8)

    def u(k, shape, fan_in):
        s = 1.0 / jnp.sqrt(jnp.float32(fan_in))
        return jax.random.uniform(k, shape, jnp.float32, -s, s)

    return {
        "gc1_w": u(ks[0], (nblocks, nfeat, nfeat), nfeat),
        "gc1_b": u(ks[1], (nblocks, 1, nfeat), nfeat),
        "fc1_w": u(ks[2], (nfeat, nhid), nfeat),
        "fc1_b": u(ks[3], (1, nhid), nfeat),
        "gc2_w": u(ks[4], (nblocks, nhid, nhid), nhid),
        "gc2_b": u(ks[5], (nblocks, 1, nhid), nhid),
        "fc2_w": u(ks[6], (nhid, nclass), nhid),
        "fc2_b": u(ks[7], (1, nclass), nhid),
    }


def reference_forward(x, adj, params, *, nblocks):
    """Plain-JAX reference mirroring the kernel's (adj @ h) @ W ordering and
    bf16-input / f32-accumulate dots."""
    adj_b = adj.astype(jnp.bfloat16)

    def block(h, w, b):
        t = jnp.dot(adj_b, h.astype(jnp.bfloat16),
                    preferred_element_type=jnp.float32)
        return jnp.dot(t.astype(jnp.bfloat16), w.astype(jnp.bfloat16),
                       preferred_element_type=jnp.float32) + b

    h = x
    for bb in range(nblocks):
        h = block(h, params["gc1_w"][bb], params["gc1_b"][bb])
    x = jax.nn.relu(h + x)
    x = jnp.dot(x.astype(jnp.bfloat16), params["fc1_w"].astype(jnp.bfloat16),
                preferred_element_type=jnp.float32) + params["fc1_b"]
    h = x
    for bb in range(nblocks):
        h = block(h, params["gc2_w"][bb], params["gc2_b"][bb])
    x = jax.nn.relu(h + x)
    x = jnp.dot(x.astype(jnp.bfloat16), params["fc2_w"].astype(jnp.bfloat16),
                preferred_element_type=jnp.float32) + params["fc2_b"]
    return jax.nn.log_softmax(x, axis=1)


if __name__ == "__main__":
    NBLOCKS, N, NFEAT, NHID, NCLASS = 2, 200, 32, 16, 8   # N=200 exercises row padding

    key = jax.random.PRNGKey(0)
    k_x, k_adj, k_p = jax.random.split(key, 3)

    x = jax.random.normal(k_x, (N, NFEAT), jnp.float32)

    # Dense, symmetric, row-normalized adjacency (stand-in for normalize_adj_tensor).
    a = jax.random.uniform(k_adj, (N, N), jnp.float32)
    a = (a + a.T) * 0.5 + jnp.eye(N, dtype=jnp.float32)
    adj = a / jnp.sum(a, axis=1, keepdims=True)

    params = init_params(k_p, nblocks=NBLOCKS, nfeat=NFEAT, nhid=NHID, nclass=NCLASS)

    out = dense_gcn_forward(x, adj, params, nblocks=NBLOCKS)
    out = jax.block_until_ready(out)

    ref = reference_forward(x, adj, params, nblocks=NBLOCKS)
    assert out.shape == (N, NCLASS)
    assert jnp.max(jnp.abs(out - ref)) < 5e-3, "mismatch vs. plain-JAX reference"

    print("KERNEL_OK")
</pallas_src>

<mosaic_0001>
module attributes {stable_mosaic.version = 11 : i64} {
  func.func @_graph_block_kernel(%arg0: i32, %arg1: i32, %arg2: memref<256x256xbf16, #tpu.memory_space<vmem>>, %arg3: memref<256x128xf32, #tpu.memory_space<vmem>>, %arg4: memref<128x128xbf16, #tpu.memory_space<vmem>>, %arg5: memref<1x128xf32, #tpu.memory_space<vmem>>, %arg6: memref<256x128xf32, #tpu.memory_space<vmem>>, %arg7: memref<256x128xf32, #tpu.memory_space<vmem>>) attributes {dimension_semantics = [#tpu.dimension_semantics<parallel>, #tpu.dimension_semantics<arbitrary>], iteration_bounds = array<i64: 1, 1>, scalar_prefetch = 0 : i64, scratch_operands = 1 : i64, tpu.core_type = #tpu.core_type<tc>, window_params = [{transform_indices = @transform_0, window_bounds = array<i64: 256, 256>}, {transform_indices = @transform_1, window_bounds = array<i64: 256, 128>}, {pipeline_mode = #tpu.pipeline_mode<synchronous>, transform_indices = @transform_2, window_bounds = array<i64: 128, 128>}, {pipeline_mode = #tpu.pipeline_mode<synchronous>, transform_indices = @transform_3, window_bounds = array<i64: 1, 128>}, {transform_indices = @transform_4, window_bounds = array<i64: 256, 128>}]} {
    %c0_i32 = arith.constant 0 : i32
    %0 = arith.cmpi eq, %arg1, %c0_i32 : i32
    %1 = arith.extui %0 : i1 to i32
    %c0_i32_0 = arith.constant 0 : i32
    %2 = arith.cmpi ne, %1, %c0_i32_0 : i32
    scf.if %2 {
      %cst_10 = arith.constant 0.000000e+00 : f32
      %13 = vector.broadcast %cst_10 : f32 to vector<256x128xf32>
      %c0_11 = arith.constant 0 : index
      %c0_12 = arith.constant 0 : index
      %14 = vector.load %arg7[%c0_11, %c0_12] : memref<256x128xf32, #tpu.memory_space<vmem>>, vector<256x128xf32>
      tpu.vector_store %arg7[%c0_11, %c0_12], %13 {strides = array<i32>} : memref<256x128xf32, #tpu.memory_space<vmem>>, vector<256x128xf32>,
    } else {
    }
    %c0 = arith.constant 0 : index
    %c0_1 = arith.constant 0 : index
    %3 = vector.load %arg7[%c0, %c0_1] : memref<256x128xf32, #tpu.memory_space<vmem>>, vector<256x128xf32>
    %c0_2 = arith.constant 0 : index
    %c0_3 = arith.constant 0 : index
    %4 = vector.load %arg2[%c0_2, %c0_3] : memref<256x256xbf16, #tpu.memory_space<vmem>>, vector<256x256xbf16>
    %c0_4 = arith.constant 0 : index
    %c0_5 = arith.constant 0 : index
    %5 = vector.load %arg3[%c0_4, %c0_5] : memref<256x128xf32, #tpu.memory_space<vmem>>, vector<256x128xf32>
    %6 = arith.truncf %5 : vector<256x128xf32> to vector<256x128xbf16>
    %cst = arith.constant dense<0.000000e+00> : vector<256x128xf32>
    %7 = tpu.matmul %4, %6, %cst {dimension_numbers = #tpu.dot_dimension_numbers<[1], [0], [0], [1], [0, 0, 1, 1], [], []>} : vector<256x256xbf16>, vector<256x128xbf16>, vector<256x128xf32> -> vector<256x128xf32>
    %8 = arith.addf %3, %7 : vector<256x128xf32>
    %c0_6 = arith.constant 0 : index
    %c0_7 = arith.constant 0 : index
    %9 = vector.load %arg7[%c0_6, %c0_7] : memref<256x128xf32, #tpu.memory_space<vmem>>, vector<256x128xf32>
    tpu.vector_store %arg7[%c0_6, %c0_7], %8 {strides = array<i32>} : memref<256x128xf32, #tpu.memory_space<vmem>>, vector<256x128xf32>,
    %c0_i32_8 = arith.constant 0 : i32
    %10 = arith.cmpi eq, %arg1, %c0_i32_8 : i32
    %11 = arith.extui %10 : i1 to i32
    %c0_i32_9 = arith.constant 0 : i32
    %12 = arith.cmpi ne, %11, %c0_i32_9 : i32
    scf.if %12 {
      %c0_10 = arith.constant 0 : index
      %c0_11 = arith.constant 0 : index
      %13 = vector.load %arg7[%c0_10, %c0_11] : memref<256x128xf32, #tpu.memory_space<vmem>>, vector<256x128xf32>
      %14 = arith.truncf %13 : vector<256x128xf32> to vector<256x128xbf16>
      %c0_12 = arith.constant 0 : index
      %c0_13 = arith.constant 0 : index
      %15 = vector.load %arg4[%c0_12, %c0_13] : memref<128x128xbf16, #tpu.memory_space<vmem>>, vector<128x128xbf16>
      %cst_14 = arith.constant dense<0.000000e+00> : vector<256x128xf32>
      %16 = tpu.matmul %14, %15, %cst_14 {dimension_numbers = #tpu.dot_dimension_numbers<[1], [0], [0], [1], [0, 0, 1, 1], [], []>} : vector<256x128xbf16>, vector<128x128xbf16>, vector<256x128xf32> -> vector<256x128xf32>
      %c0_15 = arith.constant 0 : index
      %c0_16 = arith.constant 0 : index
      %17 = vector.load %arg5[%c0_15, %c0_16] : memref<1x128xf32, #tpu.memory_space<vmem>>, vector<1x128xf32>
      %18 = vector.broadcast %17 : vector<1x128xf32> to vector<256x128xf32>
      %19 = arith.addf %16, %18 : vector<256x128xf32>
      %c0_17 = arith.constant 0 : index
      %c0_18 = arith.constant 0 : index
      %20 = vector.load %arg6[%c0_17, %c0_18] : memref<256x128xf32, #tpu.memory_space<vmem>>, vector<256x128xf32>
      tpu.vector_store %arg6[%c0_17, %c0_18], %19 {strides = array<i32>} : memref<256x128xf32, #tpu.memory_space<vmem>>, vector<256x128xf32>,
    } else {
    }
    return
  }
  func.func @transform_0(%arg0: i32, %arg1: i32) -> (i32, i32) {
    %c0_i32 = arith.constant 0 : i32
    return %arg0, %arg1 : i32, i32
  }
  func.func @transform_1(%arg0: i32, %arg1: i32) -> (i32, i32) {
    %c0_i32 = arith.constant 0 : i32
    %c0_i32_0 = arith.constant 0 : i32
    return %arg1, %c0_i32 : i32, i32
  }
  func.func @transform_2(%arg0: i32, %arg1: i32) -> (i32, i32) {
    %c0_i32 = arith.constant 0 : i32
    %c0_i32_0 = arith.constant 0 : i32
    %c0_i32_1 = arith.constant 0 : i32
    return %c0_i32, %c0_i32_0 : i32, i32
  }
  func.func @transform_3(%arg0: i32, %arg1: i32) -> (i32, i32) {
    %c0_i32 = arith.constant 0 : i32
    %c0_i32_0 = arith.constant 0 : i32
    %c0_i32_1 = arith.constant 0 : i32
    return %c0_i32, %c0_i32_0 : i32, i32
  }
  func.func @transform_4(%arg0: i32, %arg1: i32) -> (i32, i32) {
    %c0_i32 = arith.constant 0 : i32
    %c0_i32_0 = arith.constant 0 : i32
    return %arg0, %c0_i32 : i32, i32
  }
}

</mosaic_0001>

<bundles_post_ra>
// kernel: tpu_custom_call.1
= control target key start
LH: loop header
LB: loop body
LE: loop exit
PB: predicated region body
PF: predicated region fallthrough
CT: control target
= control target key end

     0   :  { %9 = vsyncpa [#allocation4], 0  ;;  %s1408_s0 = inlined_call_operand.hbm [shape: bf16[256,256], index: 0, kind: input, shape index: {}]   ;;  %s1409_s1 = inlined_call_operand.hbm [shape: f32[256,128], index: 1, kind: input, shape index: {}]   ;;  %s1410_s2 = inlined_call_operand.hbm [shape: bf16[128,128], index: 2, kind: input, shape index: {}]   ;;  %s1411_s3 = inlined_call_operand.vmem [shape: f32[1,128], index: 3, kind: input, shape index: {}]   ;;  %s1412_s4 = inlined_call_operand.hbm [shape: f32[256,128], index: 4, kind: output, shape index: {}]  }
   0x1   :  { %10 = vsyncpa [#allocation7], 0 }
   0x2   :  { %11 = vsyncpa [#allocation5], 0  ;;  %s1317_s15 = smov [#allocation6]   ;;  %s1318_s17 = smov [#allocation3]  }
   0x3   :  { %s29_s16 = sshll.u32 %s1317_s15, 4  ;;  %s17_s18 = sshll.u32 %s1318_s17, 4  ;;  %s30_s16 = int_to_ptr.vmem [resolvable:$true] %s29_s16  ;;  %s18_s18 = int_to_ptr.vmem [resolvable:$true] %s17_s18 }
   0x4   :  { %s1239_s19 = scalar_lea.vmem %s30_s16, 4096  ;;  %p1244_p1 = scmp.lt.s32.totalorder %s30_s16, %s30_s16 }
   0x5   :  { %p1240_p0 = scmp.ne.s32.totalorder %s30_s16, %s1239_s19  ;;  %p1245_p2 = scmp.lt.s32.totalorder %s1239_s19, %s1239_s19 }
   0x7   :  { %p1246_p3 = por %p1245_p2, %p1244_p1 }
   0x9   :  { %p1247_p4 = pnand %p1246_p3, %p1240_p0 }
   0xb   :  { %1250 = shalt.err (!%p1247_p4)
}
   0xc   :  { %s1319_s20 = smov 128   ;;  %s1320_s21 = smov 8  }
   0xd   :  { %35 = dma.hbm_to_vmem [thread:$0]  %s1409_s1, 4096, %s30_s16, [#allocation7], %s1319_s20, %s1319_s20, %s1320_s21  }
   0xe   :  { %s1259_s24 = scalar_lea.vmem %s18_s18, 4096  ;;  %p1264_p6 = scmp.lt.s32.totalorder %s18_s18, %s18_s18 }
   0xf   :  { %p1260_p5 = scmp.ne.s32.totalorder %s18_s18, %s1259_s24  ;;  %p1265_p7 = scmp.lt.s32.totalorder %s1259_s24, %s1259_s24 }
  0x11   :  { %p1266_p8 = por %p1265_p7, %p1264_p6 }
  0x13   :  { %p1267_p9 = pnand %p1266_p8, %p1260_p5 }
  0x15   :  { %1270 = shalt.err (!%p1267_p9)
}
  0x16   :  { %23 = dma.hbm_to_vmem [thread:$0]  %s1408_s0, 4096, %s18_s18, [#allocation4], %s1319_s20, %s1319_s20, %s1320_s21  }
  0x17   :  { %s1321_s27 = smov [#allocation8]  }
  0x18   :  { %s41_s28 = sshll.u32 %s1321_s27, 4  ;;  %s42_s28 = int_to_ptr.vmem [resolvable:$true] %s41_s28 }
  0x19   :  { %s1279_s29 = scalar_lea.vmem %s42_s28, 1024  ;;  %p1284_p11 = scmp.lt.s32.totalorder %s42_s28, %s42_s28 }
  0x1a   :  { %p1280_p10 = scmp.ne.s32.totalorder %s42_s28, %s1279_s29  ;;  %p1285_p12 = scmp.lt.s32.totalorder %s1279_s29, %s1279_s29 }
  0x1c   :  { %p1286_p13 = por %p1285_p12, %p1284_p11 }
  0x1e   :  { %p1287_p0 = pnand %p1286_p13, %p1280_p10 }
  0x20   :  { %1290 = shalt.err (!%p1287_p0)
}
  0x21   :  { %s1322_s1 = smov 64   ;;  %s1323_s30 = smov 4  }
  0x22   :  { %47 = dma.hbm_to_vmem [thread:$0]  %s1410_s2, 1024, %s42_s28, [#allocation7], %s1322_s1, %s1322_s1, %s1323_s30  }
  0x23   :  { %1311 = dma.done.wait [#allocation4], 4096  }
  0x24   :  { %1312 = vsyncadd [#allocation4], 4294963200 }
  0x25   :  { %1313 = dma.done.wait [#allocation7], 5120  }
  0x26   :  { %1314 = vsyncadd [#allocation7], 4294962176  ;;  %v190_v0 = vld [vmem:[#allocation6 + $0xf0] sm:$0xff]  ;;  %v191_v1 = vld [vmem:[#allocation6 + $0xf8] sm:$0xff] }
  0x27   :  { %v174_v2 = vld [vmem:[#allocation6 + $0x70] sm:$0xff]  ;;  %v207_v3 = vpack.c.bf16 %v191_v1, %v190_v0  ;;  %v175_v4 = vld [vmem:[#allocation6 + $0x78] sm:$0xff]  ;;  %v188_v5 = vld [vmem:[#allocation6 + $0xe0] sm:$0xff] }
  0x28   :  { %v189_v6 = vld [vmem:[#allocation6 + $0xe8] sm:$0xff]  ;;  %v199_v7 = vpack.c.bf16 %v175_v4, %v174_v2  ;;  %v172_v9 = vld [vmem:[#allocation6 + $0x60] sm:$0xff]  ;;  %v186_v11 = vld [vmem:[#allocation6 + $0xd0] sm:$0xff] }
  0x29   :  { %v206_v8 = vpack.c.bf16 %v189_v6, %v188_v5  ;;  %v173_v10 = vld [vmem:[#allocation6 + $0x68] sm:$0xff]  ;;  %967 = vmatprep.subr.bf16.mxu0 %v207_v3  ;;  %v187_v12 = vld [vmem:[#allocation6 + $0xd8] sm:$0xff]  ;;  %1151 = vmatprep.subr.bf16.mxu1 %v207_v3  ;;  %v170_v15 = vld [vmem:[#allocation6 + $0x50] sm:$0xff] }
  0x2a   :  { %968 = vmatpush3.bf16.msra.mxu0 %v199_v7  ;;  %v198_v13 = vpack.c.bf16 %v173_v10, %v172_v9  ;;  %1159 = vmatpush3.bf16.msra.mxu1 %v199_v7  ;;  %v205_v14 = vpack.c.bf16 %v187_v12, %v186_v11  ;;  %v171_v16 = vld [vmem:[#allocation6 + $0x58] sm:$0xff]  ;;  %v184_v17 = vld [vmem:[#allocation6 + $0xc0] sm:$0xff]  ;;  %v185_v18 = vld [vmem:[#allocation6 + $0xc8] sm:$0xff] }
  0x2b   :  { %969 = vmatprep.subr.bf16.mxu0 %v206_v8  ;;  %1152 = vmatprep.subr.bf16.mxu1 %v206_v8  ;;  %v197_v19 = vpack.c.bf16 %v171_v16, %v170_v15  ;;  %v204_v20 = vpack.c.bf16 %v185_v18, %v184_v17  ;;  %v168_v21 = vld [vmem:[#allocation6 + $0x40] sm:$0xff]  ;;  %v169_v22 = vld [vmem:[#allocation6 + $0x48] sm:$0xff]  ;;  %v182_v23 = vld [vmem:[#allocation6 + $0xb0] sm:$0xff] }
  0x2c   :  { %v183_v24 = vld [vmem:[#allocation6 + $0xb8] sm:$0xff]  ;;  %v1177_v25 = vld [vmem:[#allocation3 + $0x4] ss:$8 sps:$4 sm:$0xff]   ;;  %v196_v26 = vpack.c.bf16 %v169_v22, %v168_v21  ;;  %v166_v27 = vld [vmem:[#allocation6 + $0x30] sm:$0xff] }
  0x2d   :  { %v203_v28 = vpack.c.bf16 %v183_v24, %v182_v23  ;;  %v167_v29 = vld [vmem:[#allocation6 + $0x38] sm:$0xff]  ;;  %400 = vmatprep.mubr.bf16.mxu0 %v1177_v25  ;;  %v180_v30 = vld [vmem:[#allocation6 + $0xa0] sm:$0xff]  ;;  %v181_v31 = vld [vmem:[#allocation6 + $0xa8] sm:$0xff] }
  0x2e   :  { %970 = vmatpush3.bf16.msra.mxu0 %v198_v13  ;;  %1160 = vmatpush3.bf16.msra.mxu1 %v198_v13  ;;  %v195_v32 = vpack.c.bf16 %v167_v29, %v166_v27  ;;  %v164_v33 = vld [vmem:[#allocation6 + $0x20] sm:$0xff]  ;;  %v202_v34 = vpack.c.bf16 %v181_v31, %v180_v30  ;;  %v165_v35 = vld [vmem:[#allocation6 + $0x28] sm:$0xff]  ;;  %v178_v36 = vld [vmem:[#allocation6 + $0x90] sm:$0xff] }
  0x2f   :  { %971 = vmatprep.subr.bf16.mxu0 %v205_v14  ;;  %1153 = vmatprep.subr.bf16.mxu1 %v205_v14  ;;  %v179_v37 = vld [vmem:[#allocation6 + $0x98] sm:$0xff]  ;;  %v194_v38 = vpack.c.bf16 %v165_v35, %v164_v33  ;;  %v162_v39 = vld [vmem:[#allocation6 + $0x10] sm:$0xff]  ;;  %v176_v42 = vld [vmem:[#allocation6 + $0x80] sm:$0xff] }
  0x30   :  { %v201_v40 = vpack.c.bf16 %v179_v37, %v178_v36  ;;  %v163_v41 = vld [vmem:[#allocation6 + $0x18] sm:$0xff]  ;;  %v177_v43 = vld [vmem:[#allocation6 + $0x88] sm:$0xff]  ;;  %v160_v44 = vld [vmem:[#allocation6] sm:$0xff] }
  0x31   :  { %v193_v45 = vpack.c.bf16 %v163_v41, %v162_v39  ;;  %v161_v46 = vld [vmem:[#allocation6 + $0x8] sm:$0xff]  ;;  %v200_v47 = vpack.c.bf16 %v177_v43, %v176_v42  ;;  %v1178_v51 = vld [vmem:[#allocation3 + $0x14] ss:$8 sps:$4 sm:$0xff]   ;;  %v1180_v57 = vld [vmem:[#allocation3 + $0x10] ss:$8 sps:$4 sm:$0xff]  }
  0x32   :  { %972 = vmatpush3.bf16.msra.mxu0 %v197_v19  ;;  %1161 = vmatpush3.bf16.msra.mxu1 %v197_v19  ;;  %v1207_v48 = vld [vmem:[#allocation3 + $0xc4] ss:$8 sps:$4 sm:$0xff]   ;;  %v192_v49 = vpack.c.bf16 %v161_v46, %v160_v44  ;;  %v1175_v50 = vld [vmem:[#allocation3] ss:$8 sps:$4 sm:$0xff]   ;;  %v1211_v53 = vld [vmem:[#allocation3 + $0xd4] ss:$8 sps:$4 sm:$0xff]  }
  0x33   :  { %973 = vmatprep.subr.bf16.mxu0 %v204_v20  ;;  %1154 = vmatprep.subr.bf16.mxu1 %v204_v20  ;;  %v1205_v52 = vld [vmem:[#allocation3 + $0xc0] ss:$8 sps:$4 sm:$0xff]   ;;  %v1223_v54 = vld [vmem:[#allocation8 + $0x38] sm:$0xff]   ;;  %v1224_v55 = vld [vmem:[#allocation8 + $0x30] sm:$0xff]  }
  0x34   :  { %496 = vmatprep.mubr.bf16.mxu1 %v1207_v48  ;;  %v1225_v56 = vld [vmem:[#allocation8 + $0x28] sm:$0xff]   ;;  %v1213_v58 = vld [vmem:[#allocation3 + $0xd0] ss:$8 sps:$4 sm:$0xff]   ;;  %v1226_v61 = vld [vmem:[#allocation8 + $0x20] sm:$0xff]  }
  0x35   :  { %v1181_v59 = vld [vmem:[#allocation3 + $0x24] ss:$8 sps:$4 sm:$0xff]   ;;  %v1183_v62 = vld [vmem:[#allocation3 + $0x20] ss:$8 sps:$4 sm:$0xff]   ;;  %v1184_v0 = vld [vmem:[#allocation3 + $0x34] ss:$8 sps:$4 sm:$0xff]  }
  0x36   :  { %974 = vmatpush3.bf16.msra.mxu0 %v196_v26  ;;  %1162 = vmatpush3.bf16.msra.mxu1 %v196_v26  ;;  %v1217_v60 = vld [vmem:[#allocation3 + $0xe4] ss:$8 sps:$4 sm:$0xff]   ;;  %v1219_v63 = vld [vmem:[#allocation3 + $0xe0] ss:$8 sps:$4 sm:$0xff]   ;;  %v1220_v1 = vld [vmem:[#allocation3 + $0xf4] ss:$8 sps:$4 sm:$0xff]  }
  0x37   :  { %975 = vmatprep.subr.bf16.mxu0 %v203_v28  ;;  %1155 = vmatprep.subr.bf16.mxu1 %v203_v28  ;;  %v1186_v2 = vld [vmem:[#allocation3 + $0x30] ss:$8 sps:$4 sm:$0xff]   ;;  %v1187_v4 = vld [vmem:[#allocation3 + $0x44] ss:$8 sps:$4 sm:$0xff]   ;;  %v1189_v5 = vld [vmem:[#allocation3 + $0x40] ss:$8 sps:$4 sm:$0xff]  }
  0x38   :  { %v1222_v3 = vld [vmem:[#allocation3 + $0xf0] ss:$8 sps:$4 sm:$0xff]   ;;  %v1190_v6 = vld [vmem:[#allocation3 + $0x54] ss:$8 sps:$4 sm:$0xff]   ;;  %v1193_v8 = vld [vmem:[#allocation3 + $0x64] ss:$8 sps:$4 sm:$0xff]  }
  0x39   :  { %v1192_v7 = vld [vmem:[#allocation3 + $0x50] ss:$8 sps:$4 sm:$0xff]   ;;  %v1195_v9 = vld [vmem:[#allocation3 + $0x60] ss:$8 sps:$4 sm:$0xff]   ;;  %v1196_v10 = vld [vmem:[#allocation3 + $0x74] ss:$8 sps:$4 sm:$0xff]  }
  0x3a   :  { %976 = vmatpush3.bf16.msra.mxu0 %v195_v32  ;;  %1163 = vmatpush3.bf16.msra.mxu1 %v195_v32  ;;  %v1198_v11 = vld [vmem:[#allocation3 + $0x70] ss:$8 sps:$4 sm:$0xff]   ;;  %v1199_v12 = vld [vmem:[#allocation3 + $0x84] ss:$8 sps:$4 sm:$0xff]   ;;  %v1201_v13 = vld [vmem:[#allocation3 + $0x80] ss:$8 sps:$4 sm:$0xff]  }
  0x3b   :  { %977 = vmatprep.subr.bf16.mxu0 %v202_v34  ;;  %1156 = vmatprep.subr.bf16.mxu1 %v202_v34  ;;  %v1202_v14 = vld [vmem:[#allocation3 + $0x94] ss:$8 sps:$4 sm:$0xff]   ;;  %v1204_v16 = vld [vmem:[#allocation3 + $0x90] ss:$8 sps:$4 sm:$0xff]   ;;  %v1208_v17 = vld [vmem:[#allocation3 + $0xa4] ss:$8 sps:$4 sm:$0xff]  }
  0x3c   :  { %v1227_v15 = vld [vmem:[#allocation8 + $0x18] sm:$0xff]   ;;  %v1228_v18 = vld [vmem:[#allocation8 + $0x10] sm:$0xff]   ;;  %v1229_v19 = vld [vmem:[#allocation8 + $0x8] sm:$0xff]  }
  0x3d   :  { %v1210_v20 = vld [vmem:[#allocation3 + $0xa0] ss:$8 sps:$4 sm:$0xff]   ;;  %v1214_v21 = vld [vmem:[#allocation3 + $0xb4] ss:$8 sps:$4 sm:$0xff]   ;;  %v1216_v23 = vld [vmem:[#allocation3 + $0xb0] ss:$8 sps:$4 sm:$0xff]  }
  0x3e   :  { %978 = vmatpush3.bf16.msra.mxu0 %v194_v38  ;;  %1164 = vmatpush3.bf16.msra.mxu1 %v194_v38  ;;  %v1230_v22 = vld [vmem:[#allocation8] sm:$0xff]  }
  0x3f   :  { %979 = vmatprep.subr.bf16.mxu0 %v201_v40  ;;  %1157 = vmatprep.subr.bf16.mxu1 %v201_v40 }
  0x42   :  { %980 = vmatpush3.bf16.msra.mxu0 %v193_v45  ;;  %1165 = vmatpush3.bf16.msra.mxu1 %v193_v45 }
  0x43   :  { %981 = vmatprep.subr.bf16.mxu0 %v200_v47  ;;  %1158 = vmatprep.subr.bf16.mxu1 %v200_v47 }
  0x46   :  { %982 = vmatpush3.bf16.msra.mxu0 %v192_v49  ;;  %1166 = vmatpush3.bf16.msra.mxu1 %v192_v49 }
  0x47   :  { %1103 = vmatprep.subr.bf16.mxu1 %v1223_v54 }
  0x49   :  { %401 = vmatmul.mubr.bf16.vlgmr.msra.gmra.mxu0 %v1175_v50  ;;  %497 = vmatmul.mubr.bf16.vlgmr.msra.gmra.mxu1 %v1205_v52 }
  0x4a   :  { %408 = vmatprep.mubr.bf16.mxu0 %v1178_v51  ;;  %504 = vmatprep.mubr.bf16.mxu1 %v1211_v53 }
  0x4b   :  { %1104 = vmatpush3.bf16.msra.mxu1 %v1223_v54 }
  0x4c   :  { %1105 = vmatprep.subr.bf16.mxu1 %v1224_v55 }
  0x4f   :  { %1106 = vmatpush3.bf16.msra.mxu1 %v1224_v55 }
  0x50   :  { %1107 = vmatprep.subr.bf16.mxu1 %v1225_v56 }
  0x51   :  { %409 = vmatmul.mubr.bf16.gmra.mxu0 %v1180_v57  ;;  %505 = vmatmul.mubr.bf16.gmra.mxu1 %v1213_v58 }
  0x52   :  { %416 = vmatprep.mubr.bf16.mxu0 %v1181_v59  ;;  %512 = vmatprep.mubr.bf16.mxu1 %v1217_v60 }
  0x53   :  { %1108 = vmatpush3.bf16.msra.mxu1 %v1225_v56 }
  0x54   :  { %1109 = vmatprep.subr.bf16.mxu1 %v1226_v61 }
  0x57   :  { %1110 = vmatpush3.bf16.msra.mxu1 %v1226_v61 }
  0x58   :  { %1111 = vmatprep.subr.bf16.mxu1 %v1227_v15 }
  0x59   :  { %417 = vmatmul.mubr.bf16.gmra.mxu0 %v1183_v62  ;;  %513 = vmatmul.mubr.bf16.gmra.mxu1 %v1219_v63 }
  0x5a   :  { %424 = vmatprep.mubr.bf16.mxu0 %v1184_v0  ;;  %520 = vmatprep.mubr.bf16.mxu1 %v1220_v1 }
  0x5b   :  { %1112 = vmatpush3.bf16.msra.mxu1 %v1227_v15 }
  0x5c   :  { %1113 = vmatprep.subr.bf16.mxu1 %v1228_v18 }
  0x5f   :  { %1114 = vmatpush3.bf16.msra.mxu1 %v1228_v18 }
  0x60   :  { %1115 = vmatprep.subr.bf16.mxu1 %v1229_v19 }
  0x61   :  { %425 = vmatmul.mubr.bf16.gmra.mxu0 %v1186_v2  ;;  %521 = vmatmul.mubr.bf16.gmra.mxu1 %v1222_v3 }
  0x62   :  { %432 = vmatprep.mubr.bf16.mxu0 %v1187_v4 }
  0x63   :  { %1116 = vmatpush3.bf16.msra.mxu1 %v1229_v19 }
  0x64   :  { %1117 = vmatprep.subr.bf16.mxu1 %v1230_v22 }
  0x67   :  { %1118 = vmatpush3.bf16.msra.mxu1 %v1230_v22 }
  0x69   :  { %433 = vmatmul.mubr.bf16.gmra.mxu0 %v1189_v5 }
  0x6a   :  { %440 = vmatprep.mubr.bf16.mxu0 %v1190_v6 }
  0x71   :  { %441 = vmatmul.mubr.bf16.gmra.mxu0 %v1192_v7 }
  0x72   :  { %448 = vmatprep.mubr.bf16.mxu0 %v1193_v8 }
  0x79   :  { %449 = vmatmul.mubr.bf16.gmra.mxu0 %v1195_v9 }
  0x7a   :  { %456 = vmatprep.mubr.bf16.mxu0 %v1196_v10 }
  0x81   :  { %457 = vmatmul.mubr.bf16.gmra.mxu0 %v1198_v11 }
  0x82   :  { %464 = vmatprep.mubr.bf16.mxu0 %v1199_v12 }
  0x89   :  { %465 = vmatmul.mubr.bf16.gmra.mxu0 %v1201_v13 }
  0x8a   :  { %472 = vmatprep.mubr.bf16.mxu0 %v1202_v14 }
  0x91   :  { %473 = vmatmul.mubr.bf16.gmra.mxu0 %v1204_v16 }
  0x92   :  { %480 = vmatprep.mubr.bf16.mxu0 %v1208_v17 }
  0x99   :  { %481 = vmatmul.mubr.bf16.gmra.mxu0 %v1210_v20 }
  0x9a   :  { %488 = vmatprep.mubr.bf16.mxu0 %v1214_v21 }
  0xa1   :  { %489 = vmatmul.mubr.bf16.gmra.mxu0 %v1216_v23 }
 0x109   :  { %v983_v24 = vpop.f32.mrf.mxu0  ;;  %v1055_v63 = vpop.f32.mrf.mxu1 }
 0x10b   :  { %v984_v25 = vpop.f32.mrf.mxu0  ;;  %v1056_v5 = vpop.f32.mrf.mxu1 }
 0x10c   :  { %v985_v28 = vadd.f32 %v984_v25, %v983_v24 }
 0x10d   :  { %v986_v26 = vpop.f32.mrf.mxu0  ;;  %v1058_v8 = vpop.f32.mrf.mxu1 }
 0x10f   :  { %v987_v27 = vpop.f32.mrf.mxu0  ;;  %v1059_v14 = vpop.f32.mrf.mxu1 }
 0x110   :  { %v988_v29 = vadd.f32 %v987_v27, %v986_v26 }
 0x111   :  { %v989_v30 = vpop.f32.mrf.mxu0  ;;  %v1061_v17 = vpop.f32.mrf.mxu1 }
 0x112   :  { %v628_v31 = vpack.c.bf16 %v988_v29, %v985_v28 }
 0x113   :  { %v990_v32 = vpop.f32.mrf.mxu0  ;;  %v1062_v23 = vpop.f32.mrf.mxu1 }
 0x114   :  { %1119 = vmatprep.mubr.bf16.mxu1 %v628_v31  ;;  %v991_v35 = vadd.f32 %v990_v32, %v989_v30 }
 0x115   :  { %v992_v33 = vpop.f32.mrf.mxu0  ;;  %v1064_v26 = vpop.f32.mrf.mxu1 }
 0x117   :  { %v993_v34 = vpop.f32.mrf.mxu0  ;;  %v1065_v32 = vpop.f32.mrf.mxu1 }
 0x118   :  { %v994_v36 = vadd.f32 %v993_v34, %v992_v33 }
 0x119   :  { %v995_v37 = vpop.f32.mrf.mxu0 }
 0x11a   :  { %v629_v38 = vpack.c.bf16 %v994_v36, %v991_v35  ;;  %v1067_v35 = vpop.f32.mrf.mxu1 }
 0x11b   :  { %v996_v39 = vpop.f32.mrf.mxu0 }
 0x11c   :  { %1120 = vmatmul.mubr.bf16.vlgmr.msra.gmra.mxu1 %v629_v38  ;;  %v997_v42 = vadd.f32 %v996_v39, %v995_v37 }
 0x11d   :  { %v998_v40 = vpop.f32.mrf.mxu0 }
 0x11f   :  { %v999_v41 = vpop.f32.mrf.mxu0 }
 0x120   :  { %v1000_v43 = vadd.f32 %v999_v41, %v998_v40  ;;  %v1068_v41 = vpop.f32.mrf.mxu1 }
 0x121   :  { %v1001_v44 = vpop.f32.mrf.mxu0 }
 0x122   :  { %v630_v45 = vpack.c.bf16 %v1000_v43, %v997_v42 }
 0x123   :  { %v1002_v46 = vpop.f32.mrf.mxu0 }
 0x124   :  { %1123 = vmatprep.mubr.bf16.mxu1 %v630_v45  ;;  %v1003_v49 = vadd.f32 %v1002_v46, %v1001_v44  ;;  %v1070_v44 = vpop.f32.mrf.mxu1 }
 0x125   :  { %v1004_v47 = vpop.f32.mrf.mxu0 }
 0x127   :  { %v1005_v48 = vpop.f32.mrf.mxu0 }
 0x128   :  { %v1006_v50 = vadd.f32 %v1005_v48, %v1004_v47 }
 0x129   :  { %v1007_v51 = vpop.f32.mrf.mxu0 }
 0x12a   :  { %v631_v52 = vpack.c.bf16 %v1006_v50, %v1003_v49  ;;  %v1071_v50 = vpop.f32.mrf.mxu1 }
 0x12b   :  { %v1008_v53 = vpop.f32.mrf.mxu0 }
 0x12c   :  { %1124 = vmatmul.mubr.bf16.gmra.mxu1 %v631_v52  ;;  %v1009_v56 = vadd.f32 %v1008_v53, %v1007_v51  ;;  %v1057_v52 = vadd.f32 %v1056_v5, %v1055_v63  ;;  %v1060_v53 = vadd.f32 %v1059_v14, %v1058_v8  ;;  %v1368_v8 = vld [vmem:[%s1411_s3] ss:$0 sm:$0xff]  ;;  %s1324_s3 = smov [#allocation9]  }
 0x12d   :  { %v1010_v54 = vpop.f32.mrf.mxu0  ;;  %s913_s7 = sshll.u32 %s1324_s3, 4  ;;  %s914_s7 = int_to_ptr.vmem [resolvable:$true] %s913_s7 }
 0x12e   :  { %s1291_s8 = scalar_lea.vmem %s914_s7, 4096  ;;  %p1296_p2 = scmp.lt.s32.totalorder %s914_s7, %s914_s7 }
 0x12f   :  { %v1011_v55 = vpop.f32.mrf.mxu0  ;;  %p1292_p1 = scmp.ne.s32.totalorder %s914_s7, %s1291_s8  ;;  %p1297_p3 = scmp.lt.s32.totalorder %s1291_s8, %s1291_s8 }
 0x130   :  { %v1012_v57 = vadd.f32 %v1011_v55, %v1010_v54  ;;  %v1073_v55 = vpop.f32.mrf.mxu1 }
 0x131   :  { %v1013_v58 = vpop.f32.mrf.mxu0  ;;  %p1298_p4 = por %p1297_p3, %p1296_p2 }
 0x132   :  { %v632_v59 = vpack.c.bf16 %v1012_v57, %v1009_v56 }
 0x133   :  { %v1014_v60 = vpop.f32.mrf.mxu0  ;;  %p1299_p5 = pnand %p1298_p4, %p1292_p1 }
 0x134   :  { %1127 = vmatprep.mubr.bf16.mxu1 %v632_v59  ;;  %v1015_v0 = vadd.f32 %v1014_v60, %v1013_v58  ;;  %v640_v59 = vpack.c.bf16 %v1060_v53, %v1057_v52  ;;  %v1074_v60 = vpop.f32.mrf.mxu1 }
 0x135   :  { %v1016_v61 = vpop.f32.mrf.mxu0  ;;  %v1075_v63 = vadd.f32 %v1074_v60, %v1073_v55 }
 0x137   :  { %v1017_v62 = vpop.f32.mrf.mxu0 }
 0x138   :  { %v1018_v1 = vadd.f32 %v1017_v62, %v1016_v61  ;;  %v1063_v61 = vadd.f32 %v1062_v23, %v1061_v17  ;;  %v1066_v62 = vadd.f32 %v1065_v32, %v1064_v26 }
 0x139   :  { %v1019_v2 = vpop.f32.mrf.mxu0 }
 0x13a   :  { %v633_v3 = vpack.c.bf16 %v1018_v1, %v1015_v0  ;;  %v1069_v0 = vadd.f32 %v1068_v41, %v1067_v35  ;;  %v1072_v1 = vadd.f32 %v1071_v50, %v1070_v44 }
 0x13b   :  { %v1020_v4 = vpop.f32.mrf.mxu0 }
 0x13c   :  { %1128 = vmatmul.mubr.bf16.gmra.mxu1 %v633_v3  ;;  %v1021_v9 = vadd.f32 %v1020_v4, %v1019_v2  ;;  %v1076_v2 = vpop.f32.mrf.mxu1  ;;  %v641_v3 = vpack.c.bf16 %v1066_v62, %v1063_v61  ;;  %v642_v4 = vpack.c.bf16 %v1072_v1, %v1069_v0 }
 0x13d   :  { %v1022_v6 = vpop.f32.mrf.mxu0 }
 0x13f   :  { %v1023_v7 = vpop.f32.mrf.mxu0 }
 0x140   :  { %v1024_v10 = vadd.f32 %v1023_v7, %v1022_v6  ;;  %v1077_v6 = vpop.f32.mrf.mxu1 }
 0x141   :  { %v1025_v11 = vpop.f32.mrf.mxu0  ;;  %v1078_v5 = vadd.f32 %v1077_v6, %v1076_v2 }
 0x142   :  { %v634_v12 = vpack.c.bf16 %v1024_v10, %v1021_v9 }
 0x143   :  { %v1026_v13 = vpop.f32.mrf.mxu0  ;;  %v643_v7 = vpack.c.bf16 %v1078_v5, %v1075_v63 }
 0x144   :  { %1131 = vmatprep.mubr.bf16.mxu1 %v634_v12  ;;  %v1027_v18 = vadd.f32 %v1026_v13, %v1025_v11 }
 0x145   :  { %v1028_v15 = vpop.f32.mrf.mxu0 }
 0x147   :  { %v1029_v16 = vpop.f32.mrf.mxu0 }
 0x148   :  { %v1030_v19 = vadd.f32 %v1029_v16, %v1028_v15 }
 0x149   :  { %v1031_v20 = vpop.f32.mrf.mxu0 }
 0x14a   :  { %v635_v21 = vpack.c.bf16 %v1030_v19, %v1027_v18 }
 0x14b   :  { %v1032_v22 = vpop.f32.mrf.mxu0 }
 0x14c   :  { %1132 = vmatmul.mubr.bf16.gmra.mxu1 %v635_v21  ;;  %v1033_v27 = vadd.f32 %v1032_v22, %v1031_v20 }
 0x14d   :  { %v1034_v24 = vpop.f32.mrf.mxu0 }
 0x14f   :  { %v1035_v25 = vpop.f32.mrf.mxu0 }
 0x150   :  { %v1036_v28 = vadd.f32 %v1035_v25, %v1034_v24 }
 0x151   :  { %v1037_v29 = vpop.f32.mrf.mxu0 }
 0x152   :  { %v636_v30 = vpack.c.bf16 %v1036_v28, %v1033_v27 }
 0x153   :  { %v1038_v31 = vpop.f32.mrf.mxu0 }
 0x154   :  { %1135 = vmatprep.mubr.bf16.mxu1 %v636_v30  ;;  %v1039_v36 = vadd.f32 %v1038_v31, %v1037_v29 }
 0x155   :  { %v1040_v33 = vpop.f32.mrf.mxu0 }
 0x157   :  { %v1041_v34 = vpop.f32.mrf.mxu0 }
 0x158   :  { %v1042_v37 = vadd.f32 %v1041_v34, %v1040_v33 }
 0x159   :  { %v1043_v38 = vpop.f32.mrf.mxu0 }
 0x15a   :  { %v637_v39 = vpack.c.bf16 %v1042_v37, %v1039_v36 }
 0x15b   :  { %v1044_v40 = vpop.f32.mrf.mxu0 }
 0x15c   :  { %1136 = vmatmul.mubr.bf16.gmra.mxu1 %v637_v39  ;;  %v1045_v45 = vadd.f32 %v1044_v40, %v1043_v38 }
 0x15d   :  { %v1046_v42 = vpop.f32.mrf.mxu0 }
 0x15f   :  { %v1047_v43 = vpop.f32.mrf.mxu0 }
 0x160   :  { %v1048_v46 = vadd.f32 %v1047_v43, %v1046_v42 }
 0x161   :  { %v1049_v47 = vpop.f32.mrf.mxu0 }
 0x162   :  { %v638_v48 = vpack.c.bf16 %v1048_v46, %v1045_v45 }
 0x163   :  { %v1050_v49 = vpop.f32.mrf.mxu0 }
 0x164   :  { %1139 = vmatprep.mubr.bf16.mxu1 %v638_v48  ;;  %v1051_v56 = vadd.f32 %v1050_v49, %v1049_v47 }
 0x165   :  { %v1052_v51 = vpop.f32.mrf.mxu0 }
 0x167   :  { %v1053_v54 = vpop.f32.mrf.mxu0 }
 0x168   :  { %v1054_v57 = vadd.f32 %v1053_v54, %v1052_v51 }
 0x16a   :  { %v639_v58 = vpack.c.bf16 %v1054_v57, %v1051_v56 }
 0x16c   :  { %1140 = vmatmul.mubr.bf16.gmra.mxu1 %v639_v58 }
 0x16d   :  { %1143 = vmatprep.mubr.bf16.mxu1 %v640_v59 }
 0x174   :  { %1144 = vmatmul.mubr.bf16.gmra.mxu1 %v641_v3 }
 0x175   :  { %1147 = vmatprep.mubr.bf16.mxu1 %v642_v4 }
 0x17c   :  { %1148 = vmatmul.mubr.bf16.gmra.mxu1 %v643_v7 }
 0x1dc   :  { %v1121_v9 = vpop.f32.mrf.mxu1 }
 0x1dd   :  { %v758_v10 = vadd.f32 %v1121_v9, %v1368_v8 }
 0x1de   :  { %v749_v11 = vpop.f32.mrf.mxu1 }
 0x1df   :  { %878 = vst [vmem:[#allocation9 + $0x10] sm:$0xff] %v758_v10  ;;  %v750_v12 = vadd.f32 %v1368_v8, %v749_v11 }
 0x1e0   :  { %v1122_v13 = vpop.f32.mrf.mxu1 }
 0x1e1   :  { %876 = vst [vmem:[#allocation9] sm:$0xff] %v750_v12  ;;  %v761_v14 = vadd.f32 %v1122_v13, %v1368_v8 }
 0x1e2   :  { %v752_v15 = vpop.f32.mrf.mxu1 }
 0x1e3   :  { %879 = vst [vmem:[#allocation9 + $0x18] sm:$0xff] %v761_v14  ;;  %v753_v16 = vadd.f32 %v1368_v8, %v752_v15 }
 0x1e5   :  { %877 = vst [vmem:[#allocation9 + $0x8] sm:$0xff] %v753_v16 }
 0x1ec   :  { %v1125_v17 = vpop.f32.mrf.mxu1 }
 0x1ed   :  { %v774_v18 = vadd.f32 %v1125_v17, %v1368_v8 }
 0x1ee   :  { %v765_v19 = vpop.f32.mrf.mxu1 }
 0x1ef   :  { %882 = vst [vmem:[#allocation9 + $0x30] sm:$0xff] %v774_v18  ;;  %v766_v20 = vadd.f32 %v1368_v8, %v765_v19 }
 0x1f0   :  { %v1126_v21 = vpop.f32.mrf.mxu1 }
 0x1f1   :  { %880 = vst [vmem:[#allocation9 + $0x20] sm:$0xff] %v766_v20  ;;  %v777_v22 = vadd.f32 %v1126_v21, %v1368_v8 }
 0x1f2   :  { %v768_v23 = vpop.f32.mrf.mxu1 }
 0x1f3   :  { %883 = vst [vmem:[#allocation9 + $0x38] sm:$0xff] %v777_v22  ;;  %v769_v24 = vadd.f32 %v1368_v8, %v768_v23 }
 0x1f5   :  { %881 = vst [vmem:[#allocation9 + $0x28] sm:$0xff] %v769_v24 }
 0x1fc   :  { %v1129_v25 = vpop.f32.mrf.mxu1 }
 0x1fd   :  { %v790_v26 = vadd.f32 %v1129_v25, %v1368_v8 }
 0x1fe   :  { %v781_v27 = vpop.f32.mrf.mxu1 }
 0x1ff   :  { %886 = vst [vmem:[#allocation9 + $0x50] sm:$0xff] %v790_v26  ;;  %v782_v28 = vadd.f32 %v1368_v8, %v781_v27 }
 0x200   :  { %v1130_v29 = vpop.f32.mrf.mxu1 }
 0x201   :  { %884 = vst [vmem:[#allocation9 + $0x40] sm:$0xff] %v782_v28  ;;  %v793_v30 = vadd.f32 %v1130_v29, %v1368_v8 }
 0x202   :  { %v784_v31 = vpop.f32.mrf.mxu1 }
 0x203   :  { %887 = vst [vmem:[#allocation9 + $0x58] sm:$0xff] %v793_v30  ;;  %v785_v32 = vadd.f32 %v1368_v8, %v784_v31 }
 0x205   :  { %885 = vst [vmem:[#allocation9 + $0x48] sm:$0xff] %v785_v32 }
 0x20c   :  { %v1133_v33 = vpop.f32.mrf.mxu1 }
 0x20d   :  { %v806_v34 = vadd.f32 %v1133_v33, %v1368_v8 }
 0x20e   :  { %v797_v35 = vpop.f32.mrf.mxu1 }
 0x20f   :  { %890 = vst [vmem:[#allocation9 + $0x70] sm:$0xff] %v806_v34  ;;  %v798_v36 = vadd.f32 %v1368_v8, %v797_v35 }
 0x210   :  { %v1134_v37 = vpop.f32.mrf.mxu1 }
 0x211   :  { %888 = vst [vmem:[#allocation9 + $0x60] sm:$0xff] %v798_v36  ;;  %v809_v38 = vadd.f32 %v1134_v37, %v1368_v8 }
 0x212   :  { %v800_v39 = vpop.f32.mrf.mxu1 }
 0x213   :  { %891 = vst [vmem:[#allocation9 + $0x78] sm:$0xff] %v809_v38  ;;  %v801_v40 = vadd.f32 %v1368_v8, %v800_v39 }
 0x215   :  { %889 = vst [vmem:[#allocation9 + $0x68] sm:$0xff] %v801_v40 }
 0x21c   :  { %v1137_v41 = vpop.f32.mrf.mxu1 }
 0x21d   :  { %v822_v42 = vadd.f32 %v1137_v41, %v1368_v8 }
 0x21e   :  { %v813_v43 = vpop.f32.mrf.mxu1 }
 0x21f   :  { %894 = vst [vmem:[#allocation9 + $0x90] sm:$0xff] %v822_v42  ;;  %v814_v44 = vadd.f32 %v1368_v8, %v813_v43 }
 0x220   :  { %v1138_v45 = vpop.f32.mrf.mxu1 }
 0x221   :  { %892 = vst [vmem:[#allocation9 + $0x80] sm:$0xff] %v814_v44  ;;  %v825_v46 = vadd.f32 %v1138_v45, %v1368_v8 }
 0x222   :  { %v816_v47 = vpop.f32.mrf.mxu1 }
 0x223   :  { %895 = vst [vmem:[#allocation9 + $0x98] sm:$0xff] %v825_v46  ;;  %v817_v48 = vadd.f32 %v1368_v8, %v816_v47 }
 0x225   :  { %893 = vst [vmem:[#allocation9 + $0x88] sm:$0xff] %v817_v48 }
 0x22c   :  { %v1141_v49 = vpop.f32.mrf.mxu1 }
 0x22d   :  { %v838_v50 = vadd.f32 %v1141_v49, %v1368_v8 }
 0x22e   :  { %v829_v51 = vpop.f32.mrf.mxu1 }
 0x22f   :  { %898 = vst [vmem:[#allocation9 + $0xb0] sm:$0xff] %v838_v50  ;;  %v830_v52 = vadd.f32 %v1368_v8, %v829_v51 }
 0x230   :  { %v1142_v53 = vpop.f32.mrf.mxu1 }
 0x231   :  { %896 = vst [vmem:[#allocation9 + $0xa0] sm:$0xff] %v830_v52  ;;  %v841_v54 = vadd.f32 %v1142_v53, %v1368_v8 }
 0x232   :  { %v832_v55 = vpop.f32.mrf.mxu1 }
 0x233   :  { %899 = vst [vmem:[#allocation9 + $0xb8] sm:$0xff] %v841_v54  ;;  %v833_v56 = vadd.f32 %v1368_v8, %v832_v55 }
 0x234   :  { %v1145_v57 = vpop.f32.mrf.mxu1 }
 0x235   :  { %897 = vst [vmem:[#allocation9 + $0xa8] sm:$0xff] %v833_v56  ;;  %v854_v58 = vadd.f32 %v1145_v57, %v1368_v8 }
 0x236   :  { %v845_v59 = vpop.f32.mrf.mxu1 }
 0x237   :  { %902 = vst [vmem:[#allocation9 + $0xd0] sm:$0xff] %v854_v58  ;;  %v846_v60 = vadd.f32 %v1368_v8, %v845_v59 }
 0x238   :  { %v1146_v61 = vpop.f32.mrf.mxu1 }
 0x239   :  { %900 = vst [vmem:[#allocation9 + $0xc0] sm:$0xff] %v846_v60  ;;  %v857_v62 = vadd.f32 %v1146_v61, %v1368_v8 }
 0x23a   :  { %v848_v0 = vpop.f32.mrf.mxu1 }
 0x23b   :  { %903 = vst [vmem:[#allocation9 + $0xd8] sm:$0xff] %v857_v62  ;;  %v849_v1 = vadd.f32 %v1368_v8, %v848_v0 }
 0x23c   :  { %v1149_v2 = vpop.f32.mrf.mxu1 }
 0x23d   :  { %901 = vst [vmem:[#allocation9 + $0xc8] sm:$0xff] %v849_v1  ;;  %v870_v3 = vadd.f32 %v1149_v2, %v1368_v8 }
 0x23e   :  { %v861_v4 = vpop.f32.mrf.mxu1 }
 0x23f   :  { %906 = vst [vmem:[#allocation9 + $0xf0] sm:$0xff] %v870_v3  ;;  %v862_v6 = vadd.f32 %v1368_v8, %v861_v4 }
 0x240   :  { %v1150_v63 = vpop.f32.mrf.mxu1 }
 0x241   :  { %904 = vst [vmem:[#allocation9 + $0xe0] sm:$0xff] %v862_v6  ;;  %v873_v5 = vadd.f32 %v1150_v63, %v1368_v8 }
 0x242   :  { %v864_v7 = vpop.f32.mrf.mxu1 }
 0x243   :  { %907 = vst [vmem:[#allocation9 + $0xf8] sm:$0xff] %v873_v5  ;;  %v865_v9 = vadd.f32 %v1368_v8, %v864_v7 }
 0x245   :  { %905 = vst [vmem:[#allocation9 + $0xe8] sm:$0xff] %v865_v9 }
 0x246   :  { %1302 = shalt.err (!%p1299_p5)
}
 0x247   :  { %919 = dma.vmem_to_hbm [thread:$0]  %s914_s7, 4096, %s1412_s4, [#allocation5], %s1319_s20, %s1319_s20, %s1320_s21  }
 0x248   :  { %1315 = dma.done.wait [#allocation5], 4096  }
 0x249   :  { %1316 = vsyncadd [#allocation5], 4294963200 }
 0x24a   :  { %923 = vsyncpa [#allocation4], 1 }
 0x24b   :  { %924 = vsyncpa [#allocation7], 1 }
 0x24c   :  { %925 = vsyncpa [#allocation5], 1 }

</bundles_post_ra>
